<compile_context>
chip_gen: v7x
topology: tpu7x:2x2x1
jax: 0.10.0
libtpu: 0.0.40
codegen_flags: <defaults>
</compile_context>

<pallas_src>
import functools

import jax
import jax.numpy as jnp
from jax.experimental import pallas as pl
from jax.experimental.pallas import tpu as pltpu


def _round_up(x, m):
    return ((x + m - 1) // m) * m


def decoder_kernel(x_ref, wih_ref, whh_ref, bih_ref, bhh_ref,
                   fcw_ref, fcb_ref, h0_ref, out_ref, h_ref):
    """One timestep of the stacked GRU + fc + log-softmax.

    Grid: (T,). Block shapes (padded sizes Bp, P, Vp):
      x_ref   (1, Bp, P)    this step's ReLU'd embedding
      wih_ref (L, P, 3P)    fused per-gate input weights (pre-transposed)
      whh_ref (L, P, 3P)    fused per-gate recurrent weights
      bih_ref (L, 1, 3P), bhh_ref (L, 1, 3P)
      fcw_ref (P, Vp), fcb_ref (1, Vp)   (padded V columns biased to -1e30)
      h0_ref  (L, Bp, P)
      out_ref (Bp, Vp)      log-probs for this step (column block t)
      h_ref   (L, Bp, P)    hidden state; resident output block, carried over T
    """
    t = pl.program_id(0)
    L, _, P = h_ref.shape
    cdt = wih_ref.dtype                      # MXU operand dtype (f32 or bf16)

    @pl.when(t == 0)
    def _():
        h_ref[...] = h0_ref[...]

    x = x_ref[0]                             # (Bp, P), already in cdt
    for l in range(L):                       # L is small and static
        h = h_ref[l]                         # (Bp, P) f32
        # One fused (in, 3P) matmul per gate group, f32 accumulation.
        gi = jnp.dot(x, wih_ref[l], preferred_element_type=jnp.float32) + bih_ref[l]
        gh = jnp.dot(h.astype(cdt), whh_ref[l],
                     preferred_element_type=jnp.float32) + bhh_ref[l]
        r = jax.nn.sigmoid(gi[:, :P] + gh[:, :P])            # lane-aligned splits
        z = jax.nn.sigmoid(gi[:, P:2 * P] + gh[:, P:2 * P])
        n = jnp.tanh(gi[:, 2 * P:] + r * gh[:, 2 * P:])
        h_new = (1.0 - z) * n + z * h
        h_ref[l] = h_new
        x = h_new.astype(cdt)                # input to next layer / fc

    # fc + LogSoftmax for this timestep (f32), one lane-dense (Bp,Vp) store.
    # TODO(synk): at realistic V (tens of k), tile V on a second grid axis with
    # a two-pass log-softmax so fcw / logits are not fully VMEM-resident.
    logits = jnp.dot(x, fcw_ref[...], preferred_element_type=jnp.float32) + fcb_ref[...]
    m = jnp.max(logits, axis=-1, keepdims=True)
    lse = jnp.log(jnp.sum(jnp.exp(logits - m), axis=-1, keepdims=True)) + m
    out_ref[...] = logits - lse


def decoder_forward(tokens, emb, wih, whh, bih, bhh, fcw, fcb, h0,
                    *, mxu_dtype=jnp.float32):
    """tokens (B,T) int32; PyTorch-layout GRU/Linear weights; h0 (L,B,H).

    mxu_dtype: dtype of MXU operands (weights / activations fed to jnp.dot).
      Use jnp.bfloat16 on v6e/v7x for full-rate MXU; accumulation, gate math
      and the log-softmax stay f32 either way.
    """
    B, T = tokens.shape
    V, D = emb.shape
    L = h0.shape[0]
    H = whh.shape[2]

    Bp = _round_up(B, 8)                      # f32 sublane tile
    P = _round_up(max(D, H), 128)             # common lane-padded feature dim
    Vp = _round_up(V, 128)                    # lane-dense output tile

    # --- embedding gather + ReLU in the wrapper (XLA gather, no one-hot) ---
    # TODO(synk): token ids >= V are clamped by the XLA gather instead of
    # raising like PyTorch's nn.Embedding.
    x = jax.nn.relu(emb[tokens])                              # (B, T, D)
    # nn.Dropout is identity in eval mode.
    # TODO(synk): training-mode dropout (embedding + inter-layer GRU) not implemented.
    x_tm = jnp.transpose(x, (1, 0, 2))                        # (T, B, D) time-major
    x_tm = jnp.pad(x_tm, ((0, 0), (0, Bp - B), (0, P - D))).astype(mxu_dtype)

    # --- fused per-gate weights, pre-transposed to (in, 3P); each gate span
    #     padded to P lanes so the kernel's r/z/n splits are 128-aligned ---
    def fuse_w(w):                            # (3H, Din) -> (P, 3P)
        din = w.shape[1]
        parts = [jnp.pad(w[g * H:(g + 1) * H, :].T,
                         ((0, P - din), (0, P - H))) for g in range(3)]
        return jnp.concatenate(parts, axis=1)

    def fuse_b(b):                            # (1, 3H) -> (1, 3P)
        parts = [jnp.pad(b[:, g * H:(g + 1) * H], ((0, 0), (0, P - H)))
                 for g in range(3)]
        return jnp.concatenate(parts, axis=1)

    wih_f = jnp.stack([fuse_w(wih[l]) for l in range(L)]).astype(mxu_dtype)  # (L,P,3P)
    whh_f = jnp.stack([fuse_w(whh[l]) for l in range(L)]).astype(mxu_dtype)  # (L,P,3P)
    bih_f = jnp.stack([fuse_b(bih[l]) for l in range(L)])                    # (L,1,3P) f32
    bhh_f = jnp.stack([fuse_b(bhh[l]) for l in range(L)])                    # (L,1,3P) f32

    # fc: pre-transposed (H,V) -> (P,Vp); padded V columns get -1e30 bias so
    # they vanish under log-softmax.
    fcw_p = jnp.pad(fcw.T, ((0, P - H), (0, Vp - V))).astype(mxu_dtype)      # (P,Vp)
    fcb_p = jnp.concatenate(
        [fcb.astype(jnp.float32), jnp.full((1, Vp - V), -1e30, jnp.float32)], axis=1)

    h0_p = jnp.pad(h0, ((0, 0), (0, Bp - B), (0, P - H)))                    # (L,Bp,P) f32

    args = (x_tm, wih_f, whh_f, bih_f, bhh_f, fcw_p, fcb_p, h0_p)
    in_specs = [
        pl.BlockSpec((1, Bp, P), lambda t: (t, 0, 0)),        # x: per-step block
        pl.BlockSpec((L, P, 3 * P), lambda t: (0, 0, 0)),     # weights: resident
        pl.BlockSpec((L, P, 3 * P), lambda t: (0, 0, 0)),
        pl.BlockSpec((L, 1, 3 * P), lambda t: (0, 0, 0)),
        pl.BlockSpec((L, 1, 3 * P), lambda t: (0, 0, 0)),
        pl.BlockSpec((P, Vp), lambda t: (0, 0)),
        pl.BlockSpec((1, Vp), lambda t: (0, 0)),
        pl.BlockSpec((L, Bp, P), lambda t: (0, 0, 0)),
    ]
    out_specs = (
        # log-probs: lane-dense (Bp,Vp) column block per step into a (Bp,T*Vp)
        # buffer -> (B,T,V) via a free reshape, no post-kernel transpose.
        pl.BlockSpec((Bp, Vp), lambda t: (0, t)),
        # hidden state: same block every step -> VMEM-resident carry across T.
        pl.BlockSpec((L, Bp, P), lambda t: (0, 0, 0)),
    )
    # Toy shapes fit easily in VMEM on v5e/v6e/v7x; at realistic V/D, tile V and
    # set pltpu.CompilerParams(vmem_limit_bytes=...) with headroom (esp. v7x 64 MiB).
    out_flat, hT_p = pl.pallas_call(
        decoder_kernel,
        grid=(T,),
        in_specs=in_specs,
        out_specs=out_specs,
        out_shape=(jax.ShapeDtypeStruct((Bp, T * Vp), jnp.float32),
                   jax.ShapeDtypeStruct((L, Bp, P), jnp.float32)),
        compiler_params=pltpu.CompilerParams(
            dimension_semantics=("arbitrary",)),              # recurrence over T
    )(*args)

    out = out_flat.reshape(Bp, T, Vp)[:B, :, :V]              # (B, T, V)
    hT = hT_p[:, :B, :H]                                      # (L, B, H)
    return out, hT


def reference_forward(tokens, emb, wih, whh, bih, bhh, fcw, fcb, h0):
    """Pure-JAX mirror of the PyTorch Decoder.forward (GRU, eval mode)."""
    B, T = tokens.shape
    L, _, H = whh.shape
    x_all = jax.nn.relu(emb[tokens])                          # (B, T, D)
    hs = [h0[l] for l in range(L)]
    outs = []
    for t in range(T):
        x = x_all[:, t]
        for l in range(L):
            h = hs[l]
            gi = x @ wih[l].T + bih[l][0]
            gh = h @ whh[l].T + bhh[l][0]
            r = jax.nn.sigmoid(gi[:, :H] + gh[:, :H])
            z = jax.nn.sigmoid(gi[:, H:2 * H] + gh[:, H:2 * H])
            n = jnp.tanh(gi[:, 2 * H:] + r * gh[:, 2 * H:])
            h_new = (1.0 - z) * n + z * h
            hs[l] = h_new
            x = h_new
        logits = x @ fcw.T + fcb[0]
        outs.append(jax.nn.log_softmax(logits, axis=-1))
    return jnp.stack(outs, axis=1), jnp.stack(hs, axis=0)


if __name__ == "__main__":
    # Small shapes consistent with the module's __init__:
    B, T = 2, 8          # batch, sequence length
    V = 16               # length (vocab size)
    D = 32               # p_char_dim
    H = 32               # p_hidden_layers (hidden size)
    L = 2                # p_no_of_layers

    key = jax.random.PRNGKey(0)
    ks = jax.random.split(key, 10)
    k_scale = 1.0 / jnp.sqrt(H)

    tokens = jax.random.randint(ks[0], (B, T), 0, V, dtype=jnp.int32)
    emb = jax.random.normal(ks[1], (V, D), dtype=jnp.float32)
    wih = jax.random.uniform(ks[2], (L, 3 * H, D), jnp.float32, -k_scale, k_scale)
    whh = jax.random.uniform(ks[3], (L, 3 * H, H), jnp.float32, -k_scale, k_scale)
    bih = jax.random.uniform(ks[4], (L, 1, 3 * H), jnp.float32, -k_scale, k_scale)
    bhh = jax.random.uniform(ks[5], (L, 1, 3 * H), jnp.float32, -k_scale, k_scale)
    fcw = jax.random.uniform(ks[6], (V, H), jnp.float32, -k_scale, k_scale)
    fcb = jax.random.uniform(ks[7], (1, V), jnp.float32, -k_scale, k_scale)
    h0 = jax.random.normal(ks[8], (L, B, H), dtype=jnp.float32)

    ref_out, ref_hT = reference_forward(tokens, emb, wih, whh, bih, bhh,
                                        fcw, fcb, h0)

    # f32 MXU operands: tight match against the pure-JAX reference.
    fwd_f32 = jax.jit(functools.partial(decoder_forward, mxu_dtype=jnp.float32))
    out, hT = fwd_f32(tokens, emb, wih, whh, bih, bhh, fcw, fcb, h0)
    jax.block_until_ready((out, hT))
    assert out.shape == (B, T, V) and hT.shape == (L, B, H)
    assert jnp.allclose(out, ref_out, atol=1e-5, rtol=1e-5)
    assert jnp.allclose(hT, ref_hT, atol=1e-5, rtol=1e-5)

    # bf16 MXU operands (v6e/v7x fast path): f32 accumulation, gate math and
    # log-softmax stay f32, so results stay close to the f32 reference.
    fwd_bf16 = jax.jit(functools.partial(decoder_forward, mxu_dtype=jnp.bfloat16))
    out_bf, hT_bf = fwd_bf16(tokens, emb, wih, whh, bih, bhh, fcw, fcb, h0)
    jax.block_until_ready((out_bf, hT_bf))
    assert out_bf.shape == (B, T, V) and hT_bf.shape == (L, B, H)
    assert jnp.allclose(out_bf, ref_out, atol=2e-1, rtol=0)
    assert jnp.allclose(hT_bf, ref_hT, atol=2e-1, rtol=0)

    print("KERNEL_OK")
</pallas_src>

<mosaic_0001>
module attributes {stable_mosaic.version = 11 : i64} {
  func.func @decoder_kernel(%arg0: i32, %arg1: memref<1x8x128xf32, #tpu.memory_space<vmem>>, %arg2: memref<2x128x384xf32, #tpu.memory_space<vmem>>, %arg3: memref<2x128x384xf32, #tpu.memory_space<vmem>>, %arg4: memref<2x1x384xf32, #tpu.memory_space<vmem>>, %arg5: memref<2x1x384xf32, #tpu.memory_space<vmem>>, %arg6: memref<128x128xf32, #tpu.memory_space<vmem>>, %arg7: memref<1x128xf32, #tpu.memory_space<vmem>>, %arg8: memref<2x8x128xf32, #tpu.memory_space<vmem>>, %arg9: memref<8x128xf32, #tpu.memory_space<vmem>>, %arg10: memref<2x8x128xf32, #tpu.memory_space<vmem>>) attributes {dimension_semantics = [#tpu.dimension_semantics<arbitrary>], iteration_bounds = array<i64: 8>, scalar_prefetch = 0 : i64, scratch_operands = 0 : i64, tpu.core_type = #tpu.core_type<tc>, window_params = [{transform_indices = @transform_0, window_bounds = array<i64: 1, 8, 128>}, {pipeline_mode = #tpu.pipeline_mode<synchronous>, transform_indices = @transform_1, window_bounds = array<i64: 2, 128, 384>}, {pipeline_mode = #tpu.pipeline_mode<synchronous>, transform_indices = @transform_2, window_bounds = array<i64: 2, 128, 384>}, {pipeline_mode = #tpu.pipeline_mode<synchronous>, transform_indices = @transform_3, window_bounds = array<i64: 2, 1, 384>}, {pipeline_mode = #tpu.pipeline_mode<synchronous>, transform_indices = @transform_4, window_bounds = array<i64: 2, 1, 384>}, {pipeline_mode = #tpu.pipeline_mode<synchronous>, transform_indices = @transform_5, window_bounds = array<i64: 128, 128>}, {pipeline_mode = #tpu.pipeline_mode<synchronous>, transform_indices = @transform_6, window_bounds = array<i64: 1, 128>}, {pipeline_mode = #tpu.pipeline_mode<synchronous>, transform_indices = @transform_7, window_bounds = array<i64: 2, 8, 128>}, {transform_indices = @transform_8, window_bounds = array<i64: 8, 128>}, {pipeline_mode = #tpu.pipeline_mode<synchronous>, transform_indices = @transform_9, window_bounds = array<i64: 2, 8, 128>}]} {
    %c0_i32 = arith.constant 0 : i32
    %0 = arith.cmpi eq, %arg0, %c0_i32 : i32
    %1 = arith.extui %0 : i1 to i32
    %c0_i32_0 = arith.constant 0 : i32
    %2 = arith.cmpi ne, %1, %c0_i32_0 : i32
    scf.if %2 {
      %c0_56 = arith.constant 0 : index
      %c0_57 = arith.constant 0 : index
      %c0_58 = arith.constant 0 : index
      %112 = vector.load %arg8[%c0_56, %c0_57, %c0_58] : memref<2x8x128xf32, #tpu.memory_space<vmem>>, vector<2x8x128xf32>
      %c0_59 = arith.constant 0 : index
      %c0_60 = arith.constant 0 : index
      %c0_61 = arith.constant 0 : index
      %113 = vector.load %arg10[%c0_59, %c0_60, %c0_61] : memref<2x8x128xf32, #tpu.memory_space<vmem>>, vector<2x8x128xf32>
      tpu.vector_store %arg10[%c0_59, %c0_60, %c0_61], %112 {strides = array<i32>} : memref<2x8x128xf32, #tpu.memory_space<vmem>>, vector<2x8x128xf32>,
    } else {
    }
    %c0 = arith.constant 0 : index
    %c0_1 = arith.constant 0 : index
    %c0_2 = arith.constant 0 : index
    %3 = vector.load %arg1[%c0, %c0_1, %c0_2] : memref<1x8x128xf32, #tpu.memory_space<vmem>>, vector<1x8x128xf32>
    %4 = vector.shape_cast %3 : vector<1x8x128xf32> to vector<8x128xf32>
    %c0_3 = arith.constant 0 : index
    %c0_4 = arith.constant 0 : index
    %c0_5 = arith.constant 0 : index
    %5 = vector.load %arg10[%c0_3, %c0_4, %c0_5] : memref<2x8x128xf32, #tpu.memory_space<vmem>>, vector<1x8x128xf32>
    %6 = vector.shape_cast %5 : vector<1x8x128xf32> to vector<8x128xf32>
    %c0_6 = arith.constant 0 : index
    %c0_7 = arith.constant 0 : index
    %c0_8 = arith.constant 0 : index
    %7 = vector.load %arg2[%c0_6, %c0_7, %c0_8] : memref<2x128x384xf32, #tpu.memory_space<vmem>>, vector<1x128x384xf32>
    %8 = vector.shape_cast %7 : vector<1x128x384xf32> to vector<128x384xf32>
    %cst = arith.constant dense<0.000000e+00> : vector<8x384xf32>
    %9 = tpu.matmul %4, %8, %cst {dimension_numbers = #tpu.dot_dimension_numbers<[1], [0], [0], [1], [0, 0, 1, 1], [], []>} : vector<8x128xf32>, vector<128x384xf32>, vector<8x384xf32> -> vector<8x384xf32>
    %c0_9 = arith.constant 0 : index
    %c0_10 = arith.constant 0 : index
    %c0_11 = arith.constant 0 : index
    %10 = vector.load %arg4[%c0_9, %c0_10, %c0_11] : memref<2x1x384xf32, #tpu.memory_space<vmem>>, vector<1x1x384xf32>
    %11 = vector.shape_cast %10 : vector<1x1x384xf32> to vector<1x384xf32>
    %12 = vector.broadcast %11 : vector<1x384xf32> to vector<8x384xf32>
    %13 = arith.addf %9, %12 : vector<8x384xf32>
    %c0_12 = arith.constant 0 : index
    %c0_13 = arith.constant 0 : index
    %c0_14 = arith.constant 0 : index
    %14 = vector.load %arg3[%c0_12, %c0_13, %c0_14] : memref<2x128x384xf32, #tpu.memory_space<vmem>>, vector<1x128x384xf32>
    %15 = vector.shape_cast %14 : vector<1x128x384xf32> to vector<128x384xf32>
    %cst_15 = arith.constant dense<0.000000e+00> : vector<8x384xf32>
    %16 = tpu.matmul %6, %15, %cst_15 {dimension_numbers = #tpu.dot_dimension_numbers<[1], [0], [0], [1], [0, 0, 1, 1], [], []>} : vector<8x128xf32>, vector<128x384xf32>, vector<8x384xf32> -> vector<8x384xf32>
    %c0_16 = arith.constant 0 : index
    %c0_17 = arith.constant 0 : index
    %c0_18 = arith.constant 0 : index
    %17 = vector.load %arg5[%c0_16, %c0_17, %c0_18] : memref<2x1x384xf32, #tpu.memory_space<vmem>>, vector<1x1x384xf32>
    %18 = vector.shape_cast %17 : vector<1x1x384xf32> to vector<1x384xf32>
    %19 = vector.broadcast %18 : vector<1x384xf32> to vector<8x384xf32>
    %20 = arith.addf %16, %19 : vector<8x384xf32>
    %21 = vector.extract_strided_slice %13 {offsets = [0, 0], sizes = [8, 128], strides = [1, 1]} : vector<8x384xf32> to vector<8x128xf32>
    %22 = vector.extract_strided_slice %20 {offsets = [0, 0], sizes = [8, 128], strides = [1, 1]} : vector<8x384xf32> to vector<8x128xf32>
    %23 = arith.addf %21, %22 : vector<8x128xf32>
    %24 = arith.negf %23 : vector<8x128xf32>
    %25 = math.exp %24 : vector<8x128xf32>
    %cst_19 = arith.constant 1.000000e+00 : f32
    %26 = vector.broadcast %cst_19 : f32 to vector<8x128xf32>
    %27 = arith.addf %26, %25 : vector<8x128xf32>
    %28 = arith.divf %26, %27 : vector<8x128xf32>
    %29 = vector.extract_strided_slice %13 {offsets = [0, 128], sizes = [8, 128], strides = [1, 1]} : vector<8x384xf32> to vector<8x128xf32>
    %30 = vector.extract_strided_slice %20 {offsets = [0, 128], sizes = [8, 128], strides = [1, 1]} : vector<8x384xf32> to vector<8x128xf32>
    %31 = arith.addf %29, %30 : vector<8x128xf32>
    %32 = arith.negf %31 : vector<8x128xf32>
    %33 = math.exp %32 : vector<8x128xf32>
    %cst_20 = arith.constant 1.000000e+00 : f32
    %34 = vector.broadcast %cst_20 : f32 to vector<8x128xf32>
    %35 = arith.addf %34, %33 : vector<8x128xf32>
    %36 = arith.divf %34, %35 : vector<8x128xf32>
    %37 = vector.extract_strided_slice %13 {offsets = [0, 256], sizes = [8, 128], strides = [1, 1]} : vector<8x384xf32> to vector<8x128xf32>
    %38 = vector.extract_strided_slice %20 {offsets = [0, 256], sizes = [8, 128], strides = [1, 1]} : vector<8x384xf32> to vector<8x128xf32>
    %39 = arith.mulf %28, %38 : vector<8x128xf32>
    %40 = arith.addf %37, %39 : vector<8x128xf32>
    %41 = math.tanh %40 : vector<8x128xf32>
    %cst_21 = arith.constant 1.000000e+00 : f32
    %42 = vector.broadcast %cst_21 : f32 to vector<8x128xf32>
    %43 = arith.subf %42, %36 : vector<8x128xf32>
    %44 = arith.mulf %43, %41 : vector<8x128xf32>
    %45 = arith.mulf %36, %6 : vector<8x128xf32>
    %46 = arith.addf %44, %45 : vector<8x128xf32>
    %c0_22 = arith.constant 0 : index
    %c0_23 = arith.constant 0 : index
    %c0_24 = arith.constant 0 : index
    %47 = vector.load %arg10[%c0_22, %c0_23, %c0_24] : memref<2x8x128xf32, #tpu.memory_space<vmem>>, vector<1x8x128xf32>
    %48 = vector.shape_cast %47 : vector<1x8x128xf32> to vector<8x128xf32>
    %49 = vector.shape_cast %46 : vector<8x128xf32> to vector<1x8x128xf32>
    tpu.vector_store %arg10[%c0_22, %c0_23, %c0_24], %49 {strides = array<i32>} : memref<2x8x128xf32, #tpu.memory_space<vmem>>, vector<1x8x128xf32>,
    %c1 = arith.constant 1 : index
    %c0_25 = arith.constant 0 : index
    %c0_26 = arith.constant 0 : index
    %50 = vector.load %arg10[%c1, %c0_25, %c0_26] : memref<2x8x128xf32, #tpu.memory_space<vmem>>, vector<1x8x128xf32>
    %51 = vector.shape_cast %50 : vector<1x8x128xf32> to vector<8x128xf32>
    %c1_27 = arith.constant 1 : index
    %c0_28 = arith.constant 0 : index
    %c0_29 = arith.constant 0 : index
    %52 = vector.load %arg2[%c1_27, %c0_28, %c0_29] : memref<2x128x384xf32, #tpu.memory_space<vmem>>, vector<1x128x384xf32>
    %53 = vector.shape_cast %52 : vector<1x128x384xf32> to vector<128x384xf32>
    %cst_30 = arith.constant dense<0.000000e+00> : vector<8x384xf32>
    %54 = tpu.matmul %46, %53, %cst_30 {dimension_numbers = #tpu.dot_dimension_numbers<[1], [0], [0], [1], [0, 0, 1, 1], [], []>} : vector<8x128xf32>, vector<128x384xf32>, vector<8x384xf32> -> vector<8x384xf32>
    %c1_31 = arith.constant 1 : index
    %c0_32 = arith.constant 0 : index
    %c0_33 = arith.constant 0 : index
    %55 = vector.load %arg4[%c1_31, %c0_32, %c0_33] : memref<2x1x384xf32, #tpu.memory_space<vmem>>, vector<1x1x384xf32>
    %56 = vector.shape_cast %55 : vector<1x1x384xf32> to vector<1x384xf32>
    %57 = vector.broadcast %56 : vector<1x384xf32> to vector<8x384xf32>
    %58 = arith.addf %54, %57 : vector<8x384xf32>
    %c1_34 = arith.constant 1 : index
    %c0_35 = arith.constant 0 : index
    %c0_36 = arith.constant 0 : index
    %59 = vector.load %arg3[%c1_34, %c0_35, %c0_36] : memref<2x128x384xf32, #tpu.memory_space<vmem>>, vector<1x128x384xf32>
    %60 = vector.shape_cast %59 : vector<1x128x384xf32> to vector<128x384xf32>
    %cst_37 = arith.constant dense<0.000000e+00> : vector<8x384xf32>
    %61 = tpu.matmul %51, %60, %cst_37 {dimension_numbers = #tpu.dot_dimension_numbers<[1], [0], [0], [1], [0, 0, 1, 1], [], []>} : vector<8x128xf32>, vector<128x384xf32>, vector<8x384xf32> -> vector<8x384xf32>
    %c1_38 = arith.constant 1 : index
    %c0_39 = arith.constant 0 : index
    %c0_40 = arith.constant 0 : index
    %62 = vector.load %arg5[%c1_38, %c0_39, %c0_40] : memref<2x1x384xf32, #tpu.memory_space<vmem>>, vector<1x1x384xf32>
    %63 = vector.shape_cast %62 : vector<1x1x384xf32> to vector<1x384xf32>
    %64 = vector.broadcast %63 : vector<1x384xf32> to vector<8x384xf32>
    %65 = arith.addf %61, %64 : vector<8x384xf32>
    %66 = vector.extract_strided_slice %58 {offsets = [0, 0], sizes = [8, 128], strides = [1, 1]} : vector<8x384xf32> to vector<8x128xf32>
    %67 = vector.extract_strided_slice %65 {offsets = [0, 0], sizes = [8, 128], strides = [1, 1]} : vector<8x384xf32> to vector<8x128xf32>
    %68 = arith.addf %66, %67 : vector<8x128xf32>
    %69 = arith.negf %68 : vector<8x128xf32>
    %70 = math.exp %69 : vector<8x128xf32>
    %cst_41 = arith.constant 1.000000e+00 : f32
    %71 = vector.broadcast %cst_41 : f32 to vector<8x128xf32>
    %72 = arith.addf %71, %70 : vector<8x128xf32>
    %73 = arith.divf %71, %72 : vector<8x128xf32>
    %74 = vector.extract_strided_slice %58 {offsets = [0, 128], sizes = [8, 128], strides = [1, 1]} : vector<8x384xf32> to vector<8x128xf32>
    %75 = vector.extract_strided_slice %65 {offsets = [0, 128], sizes = [8, 128], strides = [1, 1]} : vector<8x384xf32> to vector<8x128xf32>
    %76 = arith.addf %74, %75 : vector<8x128xf32>
    %77 = arith.negf %76 : vector<8x128xf32>
    %78 = math.exp %77 : vector<8x128xf32>
    %cst_42 = arith.constant 1.000000e+00 : f32
    %79 = vector.broadcast %cst_42 : f32 to vector<8x128xf32>
    %80 = arith.addf %79, %78 : vector<8x128xf32>
    %81 = arith.divf %79, %80 : vector<8x128xf32>
    %82 = vector.extract_strided_slice %58 {offsets = [0, 256], sizes = [8, 128], strides = [1, 1]} : vector<8x384xf32> to vector<8x128xf32>
    %83 = vector.extract_strided_slice %65 {offsets = [0, 256], sizes = [8, 128], strides = [1, 1]} : vector<8x384xf32> to vector<8x128xf32>
    %84 = arith.mulf %73, %83 : vector<8x128xf32>
    %85 = arith.addf %82, %84 : vector<8x128xf32>
    %86 = math.tanh %85 : vector<8x128xf32>
    %cst_43 = arith.constant 1.000000e+00 : f32
    %87 = vector.broadcast %cst_43 : f32 to vector<8x128xf32>
    %88 = arith.subf %87, %81 : vector<8x128xf32>
    %89 = arith.mulf %88, %86 : vector<8x128xf32>
    %90 = arith.mulf %81, %51 : vector<8x128xf32>
    %91 = arith.addf %89, %90 : vector<8x128xf32>
    %c1_44 = arith.constant 1 : index
    %c0_45 = arith.constant 0 : index
    %c0_46 = arith.constant 0 : index
    %92 = vector.load %arg10[%c1_44, %c0_45, %c0_46] : memref<2x8x128xf32, #tpu.memory_space<vmem>>, vector<1x8x128xf32>
    %93 = vector.shape_cast %92 : vector<1x8x128xf32> to vector<8x128xf32>
    %94 = vector.shape_cast %91 : vector<8x128xf32> to vector<1x8x128xf32>
    tpu.vector_store %arg10[%c1_44, %c0_45, %c0_46], %94 {strides = array<i32>} : memref<2x8x128xf32, #tpu.memory_space<vmem>>, vector<1x8x128xf32>,
    %c0_47 = arith.constant 0 : index
    %c0_48 = arith.constant 0 : index
    %95 = vector.load %arg6[%c0_47, %c0_48] : memref<128x128xf32, #tpu.memory_space<vmem>>, vector<128x128xf32>
    %cst_49 = arith.constant dense<0.000000e+00> : vector<8x128xf32>
    %96 = tpu.matmul %91, %95, %cst_49 {dimension_numbers = #tpu.dot_dimension_numbers<[1], [0], [0], [1], [0, 0, 1, 1], [], []>} : vector<8x128xf32>, vector<128x128xf32>, vector<8x128xf32> -> vector<8x128xf32>
    %c0_50 = arith.constant 0 : index
    %c0_51 = arith.constant 0 : index
    %97 = vector.load %arg7[%c0_50, %c0_51] : memref<1x128xf32, #tpu.memory_space<vmem>>, vector<1x128xf32>
    %98 = vector.broadcast %97 : vector<1x128xf32> to vector<8x128xf32>
    %99 = arith.addf %96, %98 : vector<8x128xf32>
    %cst_52 = arith.constant dense<0xFF800000> : vector<8xf32>
    %100 = vector.multi_reduction <maximumf>, %99, %cst_52 [1] : vector<8x128xf32> to vector<8xf32>
    %101 = vector.shape_cast %100 : vector<8xf32> to vector<8x1xf32>
    %102 = vector.broadcast %101 : vector<8x1xf32> to vector<8x128xf32>
    %103 = arith.subf %99, %102 : vector<8x128xf32>
    %104 = math.exp %103 : vector<8x128xf32>
    %cst_53 = arith.constant dense<0.000000e+00> : vector<8xf32>
    %105 = vector.multi_reduction <add>, %104, %cst_53 [1] : vector<8x128xf32> to vector<8xf32>
    %106 = vector.shape_cast %105 : vector<8xf32> to vector<8x1xf32>
    %107 = math.log %106 : vector<8x1xf32>
    %108 = arith.addf %107, %101 : vector<8x1xf32>
    %109 = vector.broadcast %108 : vector<8x1xf32> to vector<8x128xf32>
    %110 = arith.subf %99, %109 : vector<8x128xf32>
    %c0_54 = arith.constant 0 : index
    %c0_55 = arith.constant 0 : index
    %111 = vector.load %arg9[%c0_54, %c0_55] : memref<8x128xf32, #tpu.memory_space<vmem>>, vector<8x128xf32>
    tpu.vector_store %arg9[%c0_54, %c0_55], %110 {strides = array<i32>} : memref<8x128xf32, #tpu.memory_space<vmem>>, vector<8x128xf32>,
    return
  }
  func.func @transform_0(%arg0: i32) -> (i32, i32, i32) {
    %c0_i32 = arith.constant 0 : i32
    %c0_i32_0 = arith.constant 0 : i32
    %c0_i32_1 = arith.constant 0 : i32
    return %arg0, %c0_i32, %c0_i32_0 : i32, i32, i32
  }
  func.func @transform_1(%arg0: i32) -> (i32, i32, i32) {
    %c0_i32 = arith.constant 0 : i32
    %c0_i32_0 = arith.constant 0 : i32
    %c0_i32_1 = arith.constant 0 : i32
    %c0_i32_2 = arith.constant 0 : i32
    return %c0_i32, %c0_i32_0, %c0_i32_1 : i32, i32, i32
  }
  func.func @transform_2(%arg0: i32) -> (i32, i32, i32) {
    %c0_i32 = arith.constant 0 : i32
    %c0_i32_0 = arith.constant 0 : i32
    %c0_i32_1 = arith.constant 0 : i32
    %c0_i32_2 = arith.constant 0 : i32
    return %c0_i32, %c0_i32_0, %c0_i32_1 : i32, i32, i32
  }
  func.func @transform_3(%arg0: i32) -> (i32, i32, i32) {
    %c0_i32 = arith.constant 0 : i32
    %c0_i32_0 = arith.constant 0 : i32
    %c0_i32_1 = arith.constant 0 : i32
    %c0_i32_2 = arith.constant 0 : i32
    return %c0_i32, %c0_i32_0, %c0_i32_1 : i32, i32, i32
  }
  func.func @transform_4(%arg0: i32) -> (i32, i32, i32) {
    %c0_i32 = arith.constant 0 : i32
    %c0_i32_0 = arith.constant 0 : i32
    %c0_i32_1 = arith.constant 0 : i32
    %c0_i32_2 = arith.constant 0 : i32
    return %c0_i32, %c0_i32_0, %c0_i32_1 : i32, i32, i32
  }
  func.func @transform_5(%arg0: i32) -> (i32, i32) {
    %c0_i32 = arith.constant 0 : i32
    %c0_i32_0 = arith.constant 0 : i32
    %c0_i32_1 = arith.constant 0 : i32
    return %c0_i32, %c0_i32_0 : i32, i32
  }
  func.func @transform_6(%arg0: i32) -> (i32, i32) {
    %c0_i32 = arith.constant 0 : i32
    %c0_i32_0 = arith.constant 0 : i32
    %c0_i32_1 = arith.constant 0 : i32
    return %c0_i32, %c0_i32_0 : i32, i32
  }
  func.func @transform_7(%arg0: i32) -> (i32, i32, i32) {
    %c0_i32 = arith.constant 0 : i32
    %c0_i32_0 = arith.constant 0 : i32
    %c0_i32_1 = arith.constant 0 : i32
    %c0_i32_2 = arith.constant 0 : i32
    return %c0_i32, %c0_i32_0, %c0_i32_1 : i32, i32, i32
  }
  func.func @transform_8(%arg0: i32) -> (i32, i32) {
    %c0_i32 = arith.constant 0 : i32
    %c0_i32_0 = arith.constant 0 : i32
    return %c0_i32, %arg0 : i32, i32
  }
  func.func @transform_9(%arg0: i32) -> (i32, i32, i32) {
    %c0_i32 = arith.constant 0 : i32
    %c0_i32_0 = arith.constant 0 : i32
    %c0_i32_1 = arith.constant 0 : i32
    %c0_i32_2 = arith.constant 0 : i32
    return %c0_i32, %c0_i32_0, %c0_i32_1 : i32, i32, i32
  }
}

</mosaic_0001>

<bundles_post_ra>
// kernel: decoder_forward.1
= control target key start
LH: loop header
LB: loop body
LE: loop exit
PB: predicated region body
PF: predicated region fallthrough
CT: control target
= control target key end

     0   :  { %s2105_s30 = smov 0   ;;  %s2873_s0 = inlined_call_operand.vmem [shape: f32[8,8,128], index: 0, kind: input, shape index: {}]   ;;  %s2874_s1 = inlined_call_operand.vmem [shape: f32[2,128,384], index: 1, kind: input, shape index: {}]   ;;  %s2875_s2 = inlined_call_operand.vmem [shape: f32[2,128,384], index: 2, kind: input, shape index: {}]   ;;  %s2876_s3 = inlined_call_operand.vmem [shape: f32[2,1,384], index: 3, kind: input, shape index: {}]   ;;  %s2877_s4 = inlined_call_operand.vmem [shape: f32[2,1,384], index: 4, kind: input, shape index: {}]   ;;  %s2878_s5 = inlined_call_operand.vmem [shape: f32[128,128], index: 5, kind: input, shape index: {}]   ;;  %s2879_s6 = inlined_call_operand.vmem [shape: f32[1,128], index: 6, kind: input, shape index: {}]   ;;  %s2880_s7 = inlined_call_operand.vmem [shape: f32[2,8,128], index: 7, kind: input, shape index: {}]   ;;  %s2881_s8 = inlined_call_operand.vmem [shape: f32[8,1024], index: 8, kind: output, shape index: {0}]   ;;  %s2882_s9 = inlined_call_operand.vmem [shape: f32[2,8,128], index: 9, kind: output, shape index: {1}]  }
   0x1 LB: > { %s1374_s10 = sadd.s32 4294967295, %s2050_s30   ;;  %p1378_p0 = scmp.ge.s32.totalorder %s2050_s30, 1  ;;  %s2050_s30 = sphi %s2105_s30, %s20_s30  }
   0x2   : > { %p284_p1 = scmp.lt.s32.totalorder %s2050_s30, 9 }
   0x4   : > { %p285_p2 = pnand %p1378_p0, %p284_p1 }
   0x5   : > { %p318_p3 = scmp.lt.s32.totalorder (!%p285_p2), %s1374_s10, 7  ;;  %p1381_p4 = scmp.ne.s32.totalorder (!%p285_p2), %s1374_s10, 0 }
   0x6   : > { %288 = sbr.rel (%p285_p2) target bundleno = 1169 (0x491), region = 52 }
   0xd   : > { %s319_s11 = scalar_select %p318_p3, %s1374_s10, 7 }
   0xe   : > { %329 = sbr.rel (%p1381_p4) target bundleno = 21 (0x15), region = 56  ;;  %v330_v0 = vld [vmem:[%s2880_s7] sm:$0xff] (!%p1381_p4)  ;;  %v331_v1 = vld [vmem:[%s2880_s7 + $0x8] sm:$0xff] (!%p1381_p4) }
   0xf   : > { %s1379_s12 = sshll.u32 %s319_s11, 3  ;;  %332 = vst [vmem:[%s2882_s9] sm:$0xff] (!%p1381_p4), %v330_v0  ;;  %333 = vst [vmem:[%s2882_s9 + $0x8] sm:$0xff] (!%p1381_p4), %v331_v1 }
  0x10   : > { %s2116_s15 = scalar_lea.vmem %s2873_s0, %s1379_s12  ;;  %s2121_s18 = scalar_lea.vmem %s2881_s8, %s1379_s12 }
  0x15 PF: > { %v337_v2 = vld [vmem:[%s2874_s1 + $0x8] sm:$0xff]  ;;  %v340_v3 = vld [vmem:[%s2874_s1 + $0x20] sm:$0xff]  ;;  %v339_v6 = vld [vmem:[%s2874_s1 + $0x18] sm:$0xff]  ;;  %v2052_v9 = vmov 0.0|0.0   ;;  %v2053_v10 = vmov 0.0   ;;  %vm2054_vm0 = vmmov 0  }
  0x16   : > { %v336_v4 = vld [vmem:[%s2874_s1] sm:$0xff]  ;;  %v1749_v5 = vpack.c.bf16 %v340_v3, %v337_v2  ;;  %v343_v7 = vld [vmem:[%s2874_s1 + $0x38] sm:$0xff]  ;;  %v346_v8 = vld [vmem:[%s2874_s1 + $0x50] sm:$0xff]  ;;  %1781 = vmatprep.subr.bf16.mxu1 %v2052_v9  ;;  %465 = vmatprep.mubr.f32.mxu0 %v2053_v10 }
  0x17   : > { %v1751_v11 = vpack.c.bf16 %v339_v6, %v336_v4  ;;  %v1753_v12 = vpack.c.bf16 %v346_v8, %v343_v7  ;;  %v342_v13 = vld [vmem:[%s2874_s1 + $0x30] sm:$0xff]  ;;  %v345_v14 = vld [vmem:[%s2874_s1 + $0x48] sm:$0xff]  ;;  %1606 = vmatprep.mubr.msk.f32.mxu1 %vm2054_vm0, %v2053_v10  ;;  %v352_v16 = vld [vmem:[%s2874_s1 + $0x80] sm:$0xff] }
  0x18   : > { %v349_v15 = vld [vmem:[%s2874_s1 + $0x68] sm:$0xff]  ;;  %1750 = vmatprep.subr.bf16.mxu0 %v1749_v5  ;;  %v1755_v17 = vpack.c.bf16 %v345_v14, %v342_v13  ;;  %v348_v19 = vld [vmem:[%s2874_s1 + $0x60] sm:$0xff]  ;;  %v351_v20 = vld [vmem:[%s2874_s1 + $0x78] sm:$0xff] }
  0x19   : > { %1752 = vmatpush1.bf16.msra.mxu0 %v1751_v11  ;;  %v1757_v18 = vpack.c.bf16 %v352_v16, %v349_v15  ;;  %v355_v21 = vld [vmem:[%s2874_s1 + $0x98] sm:$0xff]  ;;  %v358_v22 = vld [vmem:[%s2874_s1 + $0xb0] sm:$0xff]  ;;  %v1759_v23 = vpack.c.bf16 %v351_v20, %v348_v19  ;;  %v357_v26 = vld [vmem:[%s2874_s1 + $0xa8] sm:$0xff] }
  0x1a   : > { %1754 = vmatprep.subr.bf16.mxu0 %v1753_v12  ;;  %v354_v24 = vld [vmem:[%s2874_s1 + $0x90] sm:$0xff]  ;;  %v1761_v25 = vpack.c.bf16 %v358_v22, %v355_v21  ;;  %v341_v28 = vld [vmem:[%s2874_s1 + $0x28] sm:$0xff]  ;;  %v364_v30 = vld [vmem:[%s2874_s1 + $0xe0] sm:$0xff] }
  0x1b   : > { %v338_v27 = vld [vmem:[%s2874_s1 + $0x10] sm:$0xff]  ;;  %v361_v29 = vld [vmem:[%s2874_s1 + $0xc8] sm:$0xff]  ;;  %v344_v32 = vld [vmem:[%s2874_s1 + $0x40] sm:$0xff]  ;;  %v1763_v34 = vpack.c.bf16 %v357_v26, %v354_v24 }
  0x1c   : > { %v1782_v31 = vpack.c.bf16 %v341_v28, %v338_v27  ;;  %v347_v33 = vld [vmem:[%s2874_s1 + $0x58] sm:$0xff]  ;;  %v1765_v36 = vpack.c.bf16 %v364_v30, %v361_v29  ;;  %v360_v37 = vld [vmem:[%s2874_s1 + $0xc0] sm:$0xff]  ;;  %v350_v39 = vld [vmem:[%s2874_s1 + $0x70] sm:$0xff] }
  0x1d   : > { %1756 = vmatpush1.bf16.msra.mxu0 %v1755_v17  ;;  %v1785_v35 = vpack.c.bf16 %v347_v33, %v344_v32  ;;  %v363_v38 = vld [vmem:[%s2874_s1 + $0xd8] sm:$0xff]  ;;  %v370_v41 = vld [vmem:[%s2874_s1 + $0x110] sm:$0xff]  ;;  %v353_v42 = vld [vmem:[%s2874_s1 + $0x88] sm:$0xff] }
  0x1e   : > { %1758 = vmatprep.subr.bf16.mxu0 %v1757_v18  ;;  %1783 = vmatpush3.bf16.msra.mxu1 %v1782_v31  ;;  %v367_v40 = vld [vmem:[%s2874_s1 + $0xf8] sm:$0xff]  ;;  %v1767_v43 = vpack.c.bf16 %v363_v38, %v360_v37  ;;  %v366_v44 = vld [vmem:[%s2874_s1 + $0xf0] sm:$0xff]  ;;  %v1788_v45 = vpack.c.bf16 %v353_v42, %v350_v39  ;;  %v369_v47 = vld [vmem:[%s2874_s1 + $0x108] sm:$0xff] }
  0x1f   : > { %1784 = vmatprep.subr.bf16.mxu1 %v2052_v9  ;;  %v1769_v46 = vpack.c.bf16 %v370_v41, %v367_v40  ;;  %v356_v48 = vld [vmem:[%s2874_s1 + $0xa0] sm:$0xff]  ;;  %v359_v49 = vld [vmem:[%s2874_s1 + $0xb8] sm:$0xff]  ;;  %v373_v50 = vld [vmem:[%s2874_s1 + $0x128] sm:$0xff]  ;;  %v1771_v52 = vpack.c.bf16 %v369_v47, %v366_v44 }
  0x20   : > { %v376_v51 = vld [vmem:[%s2874_s1 + $0x140] sm:$0xff]  ;;  %v1791_v54 = vpack.c.bf16 %v359_v49, %v356_v48  ;;  %v375_v56 = vld [vmem:[%s2874_s1 + $0x138] sm:$0xff]  ;;  %v362_v57 = vld [vmem:[%s2874_s1 + $0xd0] sm:$0xff] }
  0x21   : > { %1760 = vmatpush1.bf16.msra.mxu0 %v1759_v23  ;;  %v372_v53 = vld [vmem:[%s2874_s1 + $0x120] sm:$0xff]  ;;  %v1773_v55 = vpack.c.bf16 %v376_v51, %v373_v50  ;;  %v365_v58 = vld [vmem:[%s2874_s1 + $0xe8] sm:$0xff]  ;;  %v379_v59 = vld [vmem:[%s2874_s1 + $0x158] sm:$0xff] }
  0x22   : > { %1762 = vmatprep.subr.bf16.mxu0 %v1761_v25  ;;  %1786 = vmatpush3.bf16.msra.mxu1 %v1785_v35  ;;  %v382_v60 = vld [vmem:[%s2874_s1 + $0x170] sm:$0xff]  ;;  %v1775_v61 = vpack.c.bf16 %v375_v56, %v372_v53  ;;  %v1794_v63 = vpack.c.bf16 %v365_v58, %v362_v57  ;;  %v381_v1 = vld [vmem:[%s2874_s1 + $0x168] sm:$0xff]  ;;  %v368_v2 = vld [vmem:[%s2874_s1 + $0x100] sm:$0xff] }
  0x23   : > { %1787 = vmatprep.subr.bf16.mxu1 %v2052_v9  ;;  %v378_v62 = vld [vmem:[%s2874_s1 + $0x150] sm:$0xff]  ;;  %v1777_v0 = vpack.c.bf16 %v382_v60, %v379_v59  ;;  %v371_v3 = vld [vmem:[%s2874_s1 + $0x118] sm:$0xff]  ;;  %v543_v4 = vld [vmem:[%s2875_s2 + $0x8] sm:$0xff] }
  0x24   : > { %v546_v5 = vld [vmem:[%s2875_s2 + $0x20] sm:$0xff]  ;;  %v1779_v6 = vpack.c.bf16 %v381_v1, %v378_v62  ;;  %v1797_v8 = vpack.c.bf16 %v371_v3, %v368_v2  ;;  %v545_v12 = vld [vmem:[%s2875_s2 + $0x18] sm:$0xff]  ;;  %v374_v13 = vld [vmem:[%s2874_s1 + $0x130] sm:$0xff] }
  0x25   : > { %1764 = vmatpush1.bf16.msra.mxu0 %v1763_v34  ;;  %v542_v7 = vld [vmem:[%s2875_s2] sm:$0xff]  ;;  %v1805_v11 = vpack.c.bf16 %v546_v5, %v543_v4  ;;  %v377_v14 = vld [vmem:[%s2874_s1 + $0x148] sm:$0xff]  ;;  %v549_v15 = vld [vmem:[%s2875_s2 + $0x38] sm:$0xff] }
  0x26   : > { %1766 = vmatprep.subr.bf16.mxu0 %v1765_v36  ;;  %1789 = vmatpush3.bf16.msra.mxu1 %v1788_v45  ;;  %v552_v16 = vld [vmem:[%s2875_s2 + $0x50] sm:$0xff]  ;;  %v334_v17 = vld [vmem:[%s2116_s15] sm:$0xff]  ;;  %v1807_v18 = vpack.c.bf16 %v545_v12, %v542_v7  ;;  %v1800_v20 = vpack.c.bf16 %v377_v14, %v374_v13  ;;  %v551_v22 = vld [vmem:[%s2875_s2 + $0x48] sm:$0xff] }
  0x27   : > { %1790 = vmatprep.subr.bf16.mxu1 %v2052_v9  ;;  %v548_v19 = vld [vmem:[%s2875_s2 + $0x30] sm:$0xff]  ;;  %v1809_v21 = vpack.c.bf16 %v552_v16, %v549_v15  ;;  %v380_v23 = vld [vmem:[%s2874_s1 + $0x160] sm:$0xff]  ;;  %v383_v24 = vld [vmem:[%s2874_s1 + $0x178] sm:$0xff] }
  0x28   : > { %v555_v25 = vld [vmem:[%s2875_s2 + $0x68] sm:$0xff]  ;;  %v558_v26 = vld [vmem:[%s2875_s2 + $0x80] sm:$0xff]  ;;  %v1811_v27 = vpack.c.bf16 %v551_v22, %v548_v19  ;;  %v1803_v29 = vpack.c.bf16 %v383_v24, %v380_v23  ;;  %v557_v31 = vld [vmem:[%s2875_s2 + $0x78] sm:$0xff] }
  0x29   : > { %1768 = vmatpush1.bf16.msra.mxu0 %v1767_v43  ;;  %v554_v28 = vld [vmem:[%s2875_s2 + $0x60] sm:$0xff]  ;;  %v1813_v30 = vpack.c.bf16 %v558_v26, %v555_v25  ;;  %v544_v32 = vld [vmem:[%s2875_s2 + $0x10] sm:$0xff]  ;;  %v547_v33 = vld [vmem:[%s2875_s2 + $0x28] sm:$0xff] }
  0x2a   : > { %1770 = vmatprep.subr.bf16.mxu0 %v1769_v46  ;;  %1792 = vmatpush3.bf16.msra.mxu1 %v1791_v54  ;;  %v561_v34 = vld [vmem:[%s2875_s2 + $0x98] sm:$0xff]  ;;  %v564_v35 = vld [vmem:[%s2875_s2 + $0xb0] sm:$0xff]  ;;  %v1815_v36 = vpack.c.bf16 %v557_v31, %v554_v28  ;;  %v1838_v38 = vpack.c.bf16 %v547_v33, %v544_v32  ;;  %v563_v40 = vld [vmem:[%s2875_s2 + $0xa8] sm:$0xff] }
  0x2b   : > { %1793 = vmatprep.subr.bf16.mxu1 %v2052_v9  ;;  %v560_v37 = vld [vmem:[%s2875_s2 + $0x90] sm:$0xff]  ;;  %v1817_v39 = vpack.c.bf16 %v564_v35, %v561_v34  ;;  %v550_v41 = vld [vmem:[%s2875_s2 + $0x40] sm:$0xff]  ;;  %v553_v42 = vld [vmem:[%s2875_s2 + $0x58] sm:$0xff] }
  0x2c   : > { %v567_v43 = vld [vmem:[%s2875_s2 + $0xc8] sm:$0xff]  ;;  %v570_v44 = vld [vmem:[%s2875_s2 + $0xe0] sm:$0xff]  ;;  %v1819_v45 = vpack.c.bf16 %v563_v40, %v560_v37  ;;  %v1841_v47 = vpack.c.bf16 %v553_v42, %v550_v41  ;;  %v569_v49 = vld [vmem:[%s2875_s2 + $0xd8] sm:$0xff] }
  0x2d   : > { %1772 = vmatpush1.bf16.msra.mxu0 %v1771_v52  ;;  %v566_v46 = vld [vmem:[%s2875_s2 + $0xc0] sm:$0xff]  ;;  %v1821_v48 = vpack.c.bf16 %v570_v44, %v567_v43  ;;  %v556_v50 = vld [vmem:[%s2875_s2 + $0x70] sm:$0xff]  ;;  %v559_v51 = vld [vmem:[%s2875_s2 + $0x88] sm:$0xff] }
  0x2e   : > { %1774 = vmatprep.subr.bf16.mxu0 %v1773_v55  ;;  %1795 = vmatpush3.bf16.msra.mxu1 %v1794_v63  ;;  %v573_v52 = vld [vmem:[%s2875_s2 + $0xf8] sm:$0xff]  ;;  %v576_v53 = vld [vmem:[%s2875_s2 + $0x110] sm:$0xff]  ;;  %v1823_v54 = vpack.c.bf16 %v569_v49, %v566_v46  ;;  %v1844_v56 = vpack.c.bf16 %v559_v51, %v556_v50  ;;  %v575_v58 = vld [vmem:[%s2875_s2 + $0x108] sm:$0xff] }
  0x2f   : > { %1796 = vmatprep.subr.bf16.mxu1 %v2052_v9  ;;  %v572_v55 = vld [vmem:[%s2875_s2 + $0xf0] sm:$0xff]  ;;  %v1825_v57 = vpack.c.bf16 %v576_v53, %v573_v52  ;;  %v562_v59 = vld [vmem:[%s2875_s2 + $0xa0] sm:$0xff]  ;;  %v565_v60 = vld [vmem:[%s2875_s2 + $0xb8] sm:$0xff] }
  0x30   : > { %v582_v62 = vld [vmem:[%s2875_s2 + $0x140] sm:$0xff]  ;;  %v1827_v63 = vpack.c.bf16 %v575_v58, %v572_v55  ;;  %v1847_v1 = vpack.c.bf16 %v565_v60, %v562_v59  ;;  %v581_v3 = vld [vmem:[%s2875_s2 + $0x138] sm:$0xff]  ;;  %v568_v4 = vld [vmem:[%s2875_s2 + $0xd0] sm:$0xff] }
  0x31   : > { %1776 = vmatpush1.bf16.msra.mxu0 %v1775_v61  ;;  %v579_v61 = vld [vmem:[%s2875_s2 + $0x128] sm:$0xff]  ;;  %v588_v7 = vld [vmem:[%s2875_s2 + $0x170] sm:$0xff]  ;;  %v574_v15 = vld [vmem:[%s2875_s2 + $0x100] sm:$0xff] }
  0x32   : > { %1778 = vmatprep.subr.bf16.mxu0 %v1777_v0  ;;  %1798 = vmatpush3.bf16.msra.mxu1 %v1797_v8  ;;  %v578_v0 = vld [vmem:[%s2875_s2 + $0x120] sm:$0xff]  ;;  %v1829_v2 = vpack.c.bf16 %v582_v62, %v579_v61  ;;  %v571_v5 = vld [vmem:[%s2875_s2 + $0xe8] sm:$0xff]  ;;  %v577_v16 = vld [vmem:[%s2875_s2 + $0x118] sm:$0xff] }
  0x33   : > { %1799 = vmatprep.subr.bf16.mxu1 %v2052_v9  ;;  %v1831_v8 = vpack.c.bf16 %v581_v3, %v578_v0  ;;  %v1850_v12 = vpack.c.bf16 %v571_v5, %v568_v4  ;;  %v587_v14 = vld [vmem:[%s2875_s2 + $0x168] sm:$0xff]  ;;  %v580_v19 = vld [vmem:[%s2875_s2 + $0x130] sm:$0xff]  ;;  %v586_v23 = vld [vmem:[%s2875_s2 + $0x160] sm:$0xff] }
  0x34   : > { %v589_v24 = vld [vmem:[%s2875_s2 + $0x178] sm:$0xff]  ;;  %v1386_v26 = vld [vmem:[%s2874_s1 + $0x188] sm:$0xff]  ;;  %v1387_v32 = vld [vmem:[%s2874_s1 + $0x190] sm:$0xff] }
  0x35   : > { %1780 = vmatpush1.bf16.msra.mxu0 %v1779_v6  ;;  %v585_v6 = vld [vmem:[%s2875_s2 + $0x158] sm:$0xff]  ;;  %v1859_v25 = vpack.c.bf16 %v589_v24, %v586_v23  ;;  %v1390_v33 = vld [vmem:[%s2874_s1 + $0x1a8] sm:$0xff]  ;;  %v1393_v41 = vld [vmem:[%s2874_s1 + $0x1c0] sm:$0xff] }
  0x36   : > { %1806 = vmatprep.subr.bf16.mxu0 %v1805_v11  ;;  %1801 = vmatpush3.bf16.msra.mxu1 %v1800_v20  ;;  %v584_v11 = vld [vmem:[%s2875_s2 + $0x150] sm:$0xff]  ;;  %v1833_v13 = vpack.c.bf16 %v588_v7, %v585_v6  ;;  %v583_v20 = vld [vmem:[%s2875_s2 + $0x148] sm:$0xff]  ;;  %v1894_v34 = vpack.c.bf16 %v1390_v33, %v1387_v32  ;;  %v1392_v35 = vld [vmem:[%s2874_s1 + $0x1b8] sm:$0xff] }
  0x37   : > { %1802 = vmatprep.subr.bf16.mxu1 %v2052_v9  ;;  %v1856_v22 = vpack.c.bf16 %v583_v20, %v580_v19  ;;  %v1396_v42 = vld [vmem:[%s2874_s1 + $0x1d8] sm:$0xff]  ;;  %v1398_v44 = vld [vmem:[%s2874_s1 + $0x1e8] sm:$0xff]  ;;  %v1397_v46 = vld [vmem:[%s2874_s1 + $0x1e0] sm:$0xff] }
  0x38   : > { %466 = vmatmul.mubr.f32.vlgmr.msra.gmra.mrb[0].mxu0 %v334_v17  ;;  %v1897_v43 = vpack.c.bf16 %v1396_v42, %v1393_v41  ;;  %v1399_v50 = vld [vmem:[%s2874_s1 + $0x1f0] sm:$0xff]  ;;  %v1402_v51 = vld [vmem:[%s2874_s1 + $0x208] sm:$0xff]  ;;  %v1404_v53 = vld [vmem:[%s2874_s1 + $0x218] sm:$0xff]  ;;  %v386_v42 = vlaneseq }
  0x39   : > { %1808 = vmatpush1.bf16.msra.mxu0 %v1807_v18  ;;  %671 = vmatprep.mubr.f32.mxu0 %v2053_v10  ;;  %v1853_v18 = vpack.c.bf16 %v577_v16, %v574_v15  ;;  %v1900_v52 = vpack.c.bf16 %v1402_v51, %v1399_v50  ;;  %v1405_v59 = vld [vmem:[%s2874_s1 + $0x220] sm:$0xff]  ;;  %v1408_v60 = vld [vmem:[%s2874_s1 + $0x238] sm:$0xff]  ;;  %v1410_v62 = vld [vmem:[%s2874_s1 + $0x248] sm:$0xff] }
  0x3a   : > { %1810 = vmatprep.subr.bf16.mxu0 %v1809_v21  ;;  %1804 = vmatpush3.bf16.msra.mxu1 %v1803_v29  ;;  %v2441_v21 = vld [vmem:[%s2882_s9] sm:$0xff]  ;;  %v1903_v61 = vpack.c.bf16 %v1408_v60, %v1405_v59  ;;  %v1411_v4 = vld [vmem:[%s2874_s1 + $0x250] sm:$0xff]  ;;  %v1414_v5 = vld [vmem:[%s2874_s1 + $0x268] sm:$0xff] }
  0x3b   : > { %1837 = vmatprep.subr.bf16.mxu1 %v2052_v9  ;;  %v1385_v29 = vld [vmem:[%s2874_s1 + $0x180] sm:$0xff]  ;;  %v1906_v6 = vpack.c.bf16 %v1414_v5, %v1411_v4  ;;  %v1416_v7 = vld [vmem:[%s2874_s1 + $0x278] sm:$0xff]  ;;  %v1423_v24 = vld [vmem:[%s2874_s1 + $0x2b0] sm:$0xff] }
  0x3c   : > { %v1420_v16 = vld [vmem:[%s2874_s1 + $0x298] sm:$0xff]  ;;  %v1430_v32 = vld [vmem:[%s2874_s1 + $0x2e8] sm:$0xff]  ;;  %v1429_v33 = vld [vmem:[%s2874_s1 + $0x2e0] sm:$0xff] }
  0x3d   : > { %1812 = vmatpush1.bf16.msra.mxu0 %v1811_v27  ;;  %1607 = vmatmul.mubr.f32.vlgmr.msra.gmra.mrb[0].mxu1 %v334_v17  ;;  %v1835_v17 = vpack.c.bf16 %v587_v14, %v584_v11  ;;  %v1389_v27 = vld [vmem:[%s2874_s1 + $0x1a0] sm:$0xff]  ;;  %v1424_v23 = vld [vmem:[%s2874_s1 + $0x2b8] sm:$0xff] }
  0x3e   : > { %1814 = vmatprep.subr.bf16.mxu0 %v1813_v30  ;;  %1839 = vmatpush3.bf16.msra.mxu1 %v1838_v38  ;;  %v1861_v28 = vpack.c.bf16 %v1389_v27, %v1386_v26  ;;  %v1388_v30 = vld [vmem:[%s2874_s1 + $0x198] sm:$0xff]  ;;  %v1391_v38 = vld [vmem:[%s2874_s1 + $0x1b0] sm:$0xff]  ;;  %v1417_v14 = vld [vmem:[%s2874_s1 + $0x280] sm:$0xff] }
  0x3f   : > { %1840 = vmatprep.subr.bf16.mxu1 %v2052_v9  ;;  %1641 = vmatprep.mubr.msk.f32.mxu1 %vm2054_vm0, %v2053_v10  ;;  %v1863_v31 = vpack.c.bf16 %v1388_v30, %v1385_v29  ;;  %v1909_v19 = vpack.c.bf16 %v1420_v16, %v1417_v14  ;;  %v1426_v26 = vld [vmem:[%s2874_s1 + $0x2c8] sm:$0xff]  ;;  %v1428_v27 = vld [vmem:[%s2874_s1 + $0x2d8] sm:$0xff]  ;;  %v1436_v16 = vld [vmem:[%s2875_s2 + $0x190] sm:$0xff] }
  0x40   : > { %v1912_v29 = vpack.c.bf16 %v1426_v26, %v1423_v24 }
  0x41   : > { %1816 = vmatpush1.bf16.msra.mxu0 %v1815_v36  ;;  %v1395_v36 = vld [vmem:[%s2874_s1 + $0x1d0] sm:$0xff] }
  0x42   : > { %1818 = vmatprep.subr.bf16.mxu0 %v1817_v39  ;;  %1842 = vmatpush3.bf16.msra.mxu1 %v1841_v47  ;;  %v1865_v37 = vpack.c.bf16 %v1395_v36, %v1392_v35  ;;  %v1394_v39 = vld [vmem:[%s2874_s1 + $0x1c8] sm:$0xff]  ;;  %v1438_v36 = vld [vmem:[%s2875_s2 + $0x1a0] sm:$0xff] }
  0x43   : > { %1843 = vmatprep.subr.bf16.mxu1 %v2052_v9  ;;  %v1867_v40 = vpack.c.bf16 %v1394_v39, %v1391_v38  ;;  %v1435_v35 = vld [vmem:[%s2875_s2 + $0x188] sm:$0xff] }
  0x44   : > { %v1917_v39 = vpack.c.bf16 %v1438_v36, %v1435_v35 }
  0x45   : > { %1820 = vmatpush1.bf16.msra.mxu0 %v1819_v45  ;;  %v1401_v45 = vld [vmem:[%s2874_s1 + $0x200] sm:$0xff] }
  0x46   : > { %1822 = vmatprep.subr.bf16.mxu0 %v1821_v48  ;;  %1845 = vmatpush3.bf16.msra.mxu1 %v1844_v56  ;;  %v1869_v47 = vpack.c.bf16 %v1401_v45, %v1398_v44  ;;  %v1400_v48 = vld [vmem:[%s2874_s1 + $0x1f8] sm:$0xff]  ;;  %v1403_v56 = vld [vmem:[%s2874_s1 + $0x210] sm:$0xff]  ;;  %v590_v45 = vld [vmem:[%s2877_s4] sm:$0x7] }
  0x47   : > { %1846 = vmatprep.subr.bf16.mxu1 %v2052_v9  ;;  %v1871_v49 = vpack.c.bf16 %v1400_v48, %v1397_v46  ;;  %v384_v46 = vld [vmem:[%s2876_s3] sm:$0x7] }
  0x49   : > { %1824 = vmatpush1.bf16.msra.mxu0 %v1823_v54  ;;  %v1407_v54 = vld [vmem:[%s2874_s1 + $0x230] sm:$0xff] }
  0x4a   : > { %1826 = vmatprep.subr.bf16.mxu0 %v1825_v57  ;;  %1848 = vmatpush3.bf16.msra.mxu1 %v1847_v1  ;;  %v1873_v55 = vpack.c.bf16 %v1407_v54, %v1404_v53  ;;  %v1406_v57 = vld [vmem:[%s2874_s1 + $0x228] sm:$0xff]  ;;  %v1409_v1 = vld [vmem:[%s2874_s1 + $0x240] sm:$0xff] }
  0x4b   : > { %1849 = vmatprep.subr.bf16.mxu1 %v2052_v9  ;;  %v1875_v58 = vpack.c.bf16 %v1406_v57, %v1403_v56 }
  0x4d   : > { %1828 = vmatpush1.bf16.msra.mxu0 %v1827_v63  ;;  %v1413_v63 = vld [vmem:[%s2874_s1 + $0x260] sm:$0xff] }
  0x4e   : > { %1830 = vmatprep.subr.bf16.mxu0 %v1829_v2  ;;  %1851 = vmatpush3.bf16.msra.mxu1 %v1850_v12  ;;  %v1877_v0 = vpack.c.bf16 %v1413_v63, %v1410_v62  ;;  %v1412_v2 = vld [vmem:[%s2874_s1 + $0x258] sm:$0xff]  ;;  %v1415_v12 = vld [vmem:[%s2874_s1 + $0x270] sm:$0xff] }
  0x4f   : > { %1852 = vmatprep.subr.bf16.mxu1 %v2052_v9  ;;  %v1879_v3 = vpack.c.bf16 %v1412_v2, %v1409_v1 }
  0x51   : > { %1832 = vmatpush1.bf16.msra.mxu0 %v1831_v8  ;;  %v1419_v8 = vld [vmem:[%s2874_s1 + $0x290] sm:$0xff] }
  0x52   : > { %1834 = vmatprep.subr.bf16.mxu0 %v1833_v13  ;;  %1854 = vmatpush3.bf16.msra.mxu1 %v1853_v18  ;;  %v1881_v11 = vpack.c.bf16 %v1419_v8, %v1416_v7  ;;  %v1418_v13 = vld [vmem:[%s2874_s1 + $0x288] sm:$0xff]  ;;  %v1425_v18 = vld [vmem:[%s2874_s1 + $0x2c0] sm:$0xff] }
  0x53   : > { %1855 = vmatprep.subr.bf16.mxu1 %v2052_v9  ;;  %v1883_v15 = vpack.c.bf16 %v1418_v13, %v1415_v12  ;;  %v1434_v13 = vld [vmem:[%s2875_s2 + $0x180] sm:$0xff] }
  0x55   : > { %1836 = vmatpush1.bf16.msra.mxu0 %v1835_v17  ;;  %v1422_v17 = vld [vmem:[%s2874_s1 + $0x2a8] sm:$0xff] }
  0x56   : > { %1857 = vmatpush3.bf16.msra.mxu1 %v1856_v22  ;;  %1862 = vmatprep.subr.bf16.mxu0 %v1861_v28  ;;  %v1885_v20 = vpack.c.bf16 %v1425_v18, %v1422_v17  ;;  %v1421_v22 = vld [vmem:[%s2874_s1 + $0x2a0] sm:$0xff]  ;;  %v1431_v28 = vld [vmem:[%s2874_s1 + $0x2f0] sm:$0xff]  ;;  %v1439_v17 = vld [vmem:[%s2875_s2 + $0x1a8] sm:$0xff] }
  0x57   : > { %1858 = vmatprep.subr.bf16.mxu1 %v2052_v9  ;;  %v1889_v30 = vpack.c.bf16 %v1431_v28, %v1428_v27  ;;  %v1950_v26 = vpack.c.bf16 %v1439_v17, %v1436_v16  ;;  %v1475_v16 = vld [vmem:[%s2875_s2 + $0x2c8] sm:$0xff]  ;;  %v1477_v17 = vld [vmem:[%s2875_s2 + $0x2d8] sm:$0xff] }
  0x58   : > { %672 = vmatmul.mubr.f32.vlgmr.msra.gmra.mrb[0].mxu0 %v2441_v21 }
  0x59   : > { %903 = vmatprep.mubr.f32.mxu0 %v2053_v10  ;;  %1864 = vmatpush1.bf16.msra.mxu0 %v1863_v31  ;;  %v1427_v31 = vld [vmem:[%s2874_s1 + $0x2d0] sm:$0xff] }
  0x5a   : > { %1860 = vmatpush3.bf16.msra.mxu1 %v1859_v25  ;;  %1866 = vmatprep.subr.bf16.mxu0 %v1865_v37  ;;  %v1887_v25 = vpack.c.bf16 %v1424_v23, %v1421_v22  ;;  %v1891_v37 = vpack.c.bf16 %v1430_v32, %v1427_v31  ;;  %v1447_v31 = vld [vmem:[%s2875_s2 + $0x1e8] sm:$0xff]  ;;  %v1450_v32 = vld [vmem:[%s2875_s2 + $0x200] sm:$0xff] }
  0x5b   : > { %1893 = vmatprep.subr.bf16.mxu1 %v2052_v9  ;;  %v1925_v36 = vpack.c.bf16 %v1450_v32, %v1447_v31  ;;  %v1212_v32 = vld [vmem:[%s2878_s5 + $0x10] sm:$0xff] }
  0x5d   : > { %1642 = vmatmul.mubr.f32.vlgmr.msra.gmra.mrb[2].mxu1 %v2441_v21  ;;  %1868 = vmatpush1.bf16.msra.mxu0 %v1867_v40 }
  0x5e   : > { %1676 = vmatprep.mubr.msk.f32.mxu1 %vm2054_vm0, %v2053_v10  ;;  %1895 = vmatpush3.bf16.msra.mxu1 %v1894_v34  ;;  %v1432_v34 = vld [vmem:[%s2874_s1 + $0x2f8] sm:$0xff] }
  0x5f   : > { %1896 = vmatprep.subr.bf16.mxu1 %v2052_v9  ;;  %1870 = vmatprep.subr.bf16.mxu0 %v1869_v47  ;;  %v1915_v38 = vpack.c.bf16 %v1432_v34, %v1429_v33  ;;  %v1446_v34 = vld [vmem:[%s2875_s2 + $0x1e0] sm:$0xff] }
  0x61   : > { %1872 = vmatpush1.bf16.msra.mxu0 %v1871_v49 }
  0x62   : > { %1898 = vmatpush3.bf16.msra.mxu1 %v1897_v43  ;;  %1874 = vmatprep.subr.bf16.mxu0 %v1873_v55  ;;  %v387_v43 = vshrl.u32 %v386_v42, 7 }
  0x63   : > { %1899 = vmatprep.subr.bf16.mxu1 %v2052_v9 }
  0x64   : > { %v2615_v44 = vsub.s32 0, %v387_v43  ;;  %v2623_v47 = vsub.s32 1, %v387_v43 }
  0x65   : > { %1876 = vmatpush1.bf16.msra.mxu0 %v1875_v58 }
  0x66   : > { %1901 = vmatpush3.bf16.msra.mxu1 %v1900_v52  ;;  %1878 = vmatprep.subr.bf16.mxu0 %v1877_v0  ;;  %v389_v48 = vrot.slane %v384_v46, %v2615_v44  ;;  %v595_v49 = vrot.slane %v590_v45, %v2615_v44  ;;  %v393_v50 = vrot.slane %v384_v46, %v2623_v47  ;;  %v2629_v0 = vsub.s32 2, %v387_v43  ;;  %v1452_v43 = vld [vmem:[%s2875_s2 + $0x210] sm:$0xff] }
  0x67   : > { %1902 = vmatprep.subr.bf16.mxu1 %v2052_v9  ;;  %v599_v51 = vrot.slane %v590_v45, %v2623_v47 }
  0x68   : > { %v1997_v52 = vadd.f32 %v595_v49, %v389_v48  ;;  %v603_v1 = vrot.slane %v590_v45, %v2629_v0  ;;  %v1455_v48 = vld [vmem:[%s2875_s2 + $0x228] sm:$0xff]  ;;  %v1454_v49 = vld [vmem:[%s2875_s2 + $0x220] sm:$0xff] }
  0x69   : > { %1880 = vmatpush1.bf16.msra.mxu0 %v1879_v3  ;;  %v1999_v54 = vadd.f32 %v599_v51, %v393_v50  ;;  %v397_v3 = vrot.slane %v384_v46, %v2629_v0  ;;  %v1457_v50 = vld [vmem:[%s2875_s2 + $0x238] sm:$0xff]  ;;  %v1459_v51 = vld [vmem:[%s2875_s2 + $0x248] sm:$0xff] }
  0x6a   : > { %1904 = vmatpush3.bf16.msra.mxu1 %v1903_v61  ;;  %1882 = vmatprep.subr.bf16.mxu0 %v1881_v11 }
  0x6b   : > { %1905 = vmatprep.subr.bf16.mxu1 %v2052_v9 }
  0x6d   : > { %1884 = vmatpush1.bf16.msra.mxu0 %v1883_v15  ;;  %v1437_v15 = vld [vmem:[%s2875_s2 + $0x198] sm:$0xff] }
  0x6e   : > { %1907 = vmatpush3.bf16.msra.mxu1 %v1906_v6  ;;  %1886 = vmatprep.subr.bf16.mxu0 %v1885_v20  ;;  %v1444_v20 = vld [vmem:[%s2875_s2 + $0x1d0] sm:$0xff]  ;;  %v1919_v24 = vpack.c.bf16 %v1437_v15, %v1434_v13 }
  0x6f   : > { %1908 = vmatprep.subr.bf16.mxu1 %v2052_v9  ;;  %v1472_v15 = vld [vmem:[%s2875_s2 + $0x2b0] sm:$0xff] }
  0x71   : > { %1888 = vmatpush1.bf16.msra.mxu0 %v1887_v25  ;;  %v1440_v25 = vld [vmem:[%s2875_s2 + $0x1b0] sm:$0xff] }
  0x72   : > { %1910 = vmatpush3.bf16.msra.mxu1 %v1909_v19  ;;  %1890 = vmatprep.subr.bf16.mxu0 %v1889_v30  ;;  %v1441_v19 = vld [vmem:[%s2875_s2 + $0x1b8] sm:$0xff]  ;;  %v1442_v30 = vld [vmem:[%s2875_s2 + $0x1c0] sm:$0xff] }
  0x73   : > { %1911 = vmatprep.subr.bf16.mxu1 %v2052_v9  ;;  %v1921_v28 = vpack.c.bf16 %v1444_v20, %v1441_v19  ;;  %v1476_v20 = vld [vmem:[%s2875_s2 + $0x2d0] sm:$0xff] }
  0x75   : > { %1892 = vmatpush1.bf16.msra.mxu0 %v1891_v37  ;;  %v1449_v37 = vld [vmem:[%s2875_s2 + $0x1f8] sm:$0xff] }
  0x76   : > { %1913 = vmatpush3.bf16.msra.mxu1 %v1912_v29  ;;  %1918 = vmatprep.subr.bf16.mxu0 %v1917_v39  ;;  %v1443_v29 = vld [vmem:[%s2875_s2 + $0x1c8] sm:$0xff]  ;;  %v1927_v42 = vpack.c.bf16 %v1449_v37, %v1446_v34  ;;  %v1214_v34 = vld [vmem:[%s2878_s5 + $0x20] sm:$0xff]  ;;  %v1216_v37 = vld [vmem:[%s2878_s5 + $0x30] sm:$0xff] }
  0x77   : > { %1914 = vmatprep.subr.bf16.mxu1 %v2052_v9  ;;  %v1923_v33 = vpack.c.bf16 %v1443_v29, %v1440_v25  ;;  %v1451_v39 = vld [vmem:[%s2875_s2 + $0x208] sm:$0xff]  ;;  %v1478_v25 = vld [vmem:[%s2875_s2 + $0x2e0] sm:$0xff] }
  0x78   : > { %v2788_v29 = vld [vmem:[%s2882_s9 + $0x8] sm:$0xff] }
  0x7a   : > { %1916 = vmatpush3.bf16.msra.mxu1 %v1915_v38  ;;  %v1448_v38 = vld [vmem:[%s2875_s2 + $0x1f0] sm:$0xff] }
  0x7b   : > { %1949 = vmatprep.subr.bf16.mxu1 %v2052_v9  ;;  %v1956_v45 = vpack.c.bf16 %v1451_v39, %v1448_v38  ;;  %v1217_v38 = vld [vmem:[%s2878_s5 + $0x38] sm:$0xff] }
  0x7c   : > { %v1983_v39 = vpack.c.bf16 %v1217_v38, %v1216_v37 }
 0x110   : > { %v538_v40 = vpop.f32.mrb[0].mxu1 }
 0x111   : > { %v1608_v41 = vpop.f32.mrb[1].mxu1  ;;  %v539_v7 = vadd.f32 %v538_v40, %v397_v3  ;;  %v1453_v40 = vld [vmem:[%s2875_s2 + $0x218] sm:$0xff]  ;;  %v1467_v3 = vld [vmem:[%s2875_s2 + $0x288] sm:$0xff] }
 0x112   : > { %v1456_v41 = vld [vmem:[%s2875_s2 + $0x230] sm:$0xff] }
 0x113   : > { %v1929_v46 = vpack.c.bf16 %v1456_v41, %v1453_v40  ;;  %v1218_v40 = vld [vmem:[%s2878_s5 + $0x40] sm:$0xff]  ;;  %v1219_v41 = vld [vmem:[%s2878_s5 + $0x48] sm:$0xff] }
 0x12b   : > { %v673_v53 = vpop.f32.mrb[0].mxu0 }
 0x12c   : > { %v1998_v55 = vadd.f32 %v1997_v52, %v673_v53  ;;  %v675_v56 = vpop.f32.mrb[1].mxu0  ;;  %v1462_v52 = vld [vmem:[%s2875_s2 + $0x260] sm:$0xff]  ;;  %v1931_v53 = vpack.c.bf16 %v1455_v48, %v1452_v43  ;;  %v1220_v43 = vld [vmem:[%s2878_s5 + $0x50] sm:$0xff] }
 0x12d   : > { %v2000_v58 = vadd.f32 %v1999_v54, %v675_v56  ;;  %v1458_v54 = vld [vmem:[%s2875_s2 + $0x240] sm:$0xff]  ;;  %v1933_v56 = vpack.c.bf16 %v1462_v52, %v1459_v51  ;;  %v1224_v51 = vld [vmem:[%s2878_s5 + $0x70] sm:$0xff]  ;;  %v1225_v52 = vld [vmem:[%s2878_s5 + $0x78] sm:$0xff] }
 0x12e   : > { %v1382_v57 = vmul.f32 -1.442695, %v1998_v55  ;;  %v1959_v55 = vpack.c.bf16 %v1457_v50, %v1454_v49  ;;  %v1222_v48 = vld [vmem:[%s2878_s5 + $0x60] sm:$0xff]  ;;  %v1223_v49 = vld [vmem:[%s2878_s5 + $0x68] sm:$0xff] }
 0x12f   : > { %v1383_v59 = vmul.f32 -1.442695, %v2000_v58  ;;  %v1460_v58 = vld [vmem:[%s2875_s2 + $0x250] sm:$0xff]  ;;  %v1992_v50 = vpack.c.bf16 %v1223_v49, %v1222_v48 }
 0x130   : > { %2020 = vpow2.f32 %v1382_v57  ;;  %v744_v60 = vpop.f32.mrb[2].mxu1  ;;  %v1461_v57 = vld [vmem:[%s2875_s2 + $0x258] sm:$0xff] }
 0x131   : > { %v1643_v61 = vpop.f32.mrb[3].mxu1  ;;  %2022 = vpow2.f32 %v1383_v59  ;;  %v745_v5 = vadd.f32 %v744_v60, %v603_v1  ;;  %v1463_v59 = vld [vmem:[%s2875_s2 + $0x268] sm:$0xff]  ;;  %v1465_v60 = vld [vmem:[%s2875_s2 + $0x278] sm:$0xff] }
 0x132   : > { %v1468_v61 = vld [vmem:[%s2875_s2 + $0x290] sm:$0xff]  ;;  %v1962_v1 = vpack.c.bf16 %v1463_v59, %v1460_v58 }
 0x13a   : > { %v2021_v62 = vpop.eup %2020 }
 0x13b   : > { %v752_v63 = vadd.f32 1.0, %v2021_v62  ;;  %v2023_v2 = vpop.eup %2022  ;;  %v1935_v62 = vpack.c.bf16 %v1461_v57, %v1458_v54  ;;  %v1433_v57 = vld [vmem:[%s2876_s3 + $0x3] sm:$0x7] }
 0x13c   : > { %v759_v4 = vadd.f32 1.0, %v2023_v2  ;;  %v1937_v2 = vpack.c.bf16 %v1468_v61, %v1465_v60  ;;  %v827_v58 = vrot.slane %v1433_v57, %v2615_v44  ;;  %v831_v60 = vrot.slane %v1433_v57, %v2623_v47 }
 0x13d   : > { %2024 = vrcp.f32 %v752_v63  ;;  %v1464_v63 = vld [vmem:[%s2875_s2 + $0x270] sm:$0xff] }
 0x13e   : > { %2026 = vrcp.f32 %v759_v4  ;;  %v1466_v4 = vld [vmem:[%s2875_s2 + $0x280] sm:$0xff] }
 0x147   : > { %v2025_v6 = vpop.eup %2024 }
 0x148   : > { %v762_v8 = vmul.f32 %v2025_v6, %v745_v5  ;;  %v2027_v12 = vpop.eup %2026  ;;  %v1469_v5 = vld [vmem:[%s2875_s2 + $0x298] sm:$0xff]  ;;  %v1471_v6 = vld [vmem:[%s2875_s2 + $0x2a8] sm:$0xff] }
 0x149   : > { %v765_v14 = vsub.f32 1.0, %v2027_v12  ;;  %v767_v23 = vmul.f32 %v2027_v12, %v2441_v21  ;;  %v1445_v21 = vld [vmem:[%s2875_s2 + $0x1d8] sm:$0xff]  ;;  %v1965_v12 = vpack.c.bf16 %v1469_v5, %v1466_v4 }
 0x14a   : > { %v763_v11 = vadd.f32 %v762_v8, %v539_v7  ;;  %v1953_v35 = vpack.c.bf16 %v1445_v21, %v1442_v30  ;;  %v1474_v7 = vld [vmem:[%s2875_s2 + $0x2c0] sm:$0xff]  ;;  %v1939_v8 = vpack.c.bf16 %v1467_v3, %v1464_v63  ;;  %v1211_v21 = vld [vmem:[%s2878_s5 + $0x8] sm:$0xff] }
 0x14b   : > { %v1941_v13 = vpack.c.bf16 %v1474_v7, %v1471_v6  ;;  %v1210_v30 = vld [vmem:[%s2878_s5] sm:$0xff] }
 0x14c   : > { %2028 = vtanh.f32 %v763_v11  ;;  %v1470_v11 = vld [vmem:[%s2875_s2 + $0x2a0] sm:$0xff]  ;;  %v1974_v31 = vpack.c.bf16 %v1211_v21, %v1210_v30 }
 0x156   : > { %v2029_v18 = vpop.eup %2028 }
 0x157   : > { %v766_v22 = vmul.f32 %v2029_v18, %v765_v14  ;;  %v1473_v14 = vld [vmem:[%s2875_s2 + $0x2b8] sm:$0xff]  ;;  %v1480_v18 = vld [vmem:[%s2875_s2 + $0x2f0] sm:$0xff] }
 0x158   : > { %v1943_v19 = vpack.c.bf16 %v1473_v14, %v1470_v11 }
 0x159   : > { %v768_v27 = vadd.f32 %v767_v23, %v766_v22  ;;  %v1968_v22 = vpack.c.bf16 %v1475_v16, %v1472_v15  ;;  %v1945_v23 = vpack.c.bf16 %v1480_v18, %v1477_v17 }
 0x15b   : > { %769 = vst [vmem:[%s2882_s9] sm:$0xff] %v768_v27  ;;  %904 = vmatmul.mubr.f32.vlgmr.msra.gmra.mrb[2].mxu0 %v768_v27  ;;  %1677 = vmatmul.mubr.f32.vlgmr.msra.gmra.mrb[4].mxu1 %v768_v27 }
 0x15c   : > { %1920 = vmatpush1.bf16.msra.mxu0 %v1919_v24  ;;  %1951 = vmatpush3.bf16.msra.mxu1 %v1950_v26  ;;  %v1479_v24 = vld [vmem:[%s2875_s2 + $0x2e8] sm:$0xff]  ;;  %v1481_v26 = vld [vmem:[%s2875_s2 + $0x2f8] sm:$0xff] }
 0x15d   : > { %1922 = vmatprep.subr.bf16.mxu0 %v1921_v28  ;;  %1952 = vmatprep.subr.bf16.mxu1 %v2052_v9  ;;  %v1947_v27 = vpack.c.bf16 %v1479_v24, %v1476_v20  ;;  %v1971_v28 = vpack.c.bf16 %v1481_v26, %v1478_v25 }
 0x15e   : > { %1111 = vmatprep.mubr.f32.mxu0 %v2053_v10  ;;  %1711 = vmatprep.mubr.msk.f32.mxu1 %vm2054_vm0, %v2053_v10 }
 0x160   : > { %1924 = vmatpush1.bf16.msra.mxu0 %v1923_v33  ;;  %1954 = vmatpush3.bf16.msra.mxu1 %v1953_v35  ;;  %v1215_v35 = vld [vmem:[%s2878_s5 + $0x28] sm:$0xff] }
 0x161   : > { %1926 = vmatprep.subr.bf16.mxu0 %v1925_v36  ;;  %1955 = vmatprep.subr.bf16.mxu1 %v2052_v9  ;;  %v1980_v36 = vpack.c.bf16 %v1215_v35, %v1214_v34 }
 0x164   : > { %1928 = vmatpush1.bf16.msra.mxu0 %v1927_v42  ;;  %1957 = vmatpush3.bf16.msra.mxu1 %v1956_v45  ;;  %v1986_v42 = vpack.c.bf16 %v1219_v41, %v1218_v40  ;;  %v1221_v45 = vld [vmem:[%s2878_s5 + $0x58] sm:$0xff] }
 0x165   : > { %1930 = vmatprep.subr.bf16.mxu0 %v1929_v46  ;;  %1958 = vmatprep.subr.bf16.mxu1 %v2052_v9  ;;  %v1989_v46 = vpack.c.bf16 %v1221_v45, %v1220_v43 }
 0x168   : > { %1932 = vmatpush1.bf16.msra.mxu0 %v1931_v53  ;;  %1960 = vmatpush3.bf16.msra.mxu1 %v1959_v55  ;;  %v1995_v53 = vpack.c.bf16 %v1225_v52, %v1224_v51 }
 0x169   : > { %1934 = vmatprep.subr.bf16.mxu0 %v1933_v56  ;;  %1961 = vmatprep.subr.bf16.mxu1 %v2052_v9  ;;  %v1482_v56 = vld [vmem:[%s2877_s4 + $0x3] sm:$0x7] }
 0x16a   : > { %v1035_v59 = vrot.slane %v1482_v56, %v2615_v44  ;;  %v1039_v61 = vrot.slane %v1482_v56, %v2623_v47  ;;  %v1043_v44 = vrot.slane %v1482_v56, %v2629_v0  ;;  %v835_v47 = vrot.slane %v1433_v57, %v2629_v0  ;;  %v1486_v0 = vld [vmem:[%s2879_s6] ss:$0 sm:$0xff] }
 0x16c   : > { %1936 = vmatpush1.bf16.msra.mxu0 %v1935_v62  ;;  %1963 = vmatpush3.bf16.msra.mxu1 %v1962_v1  ;;  %v2003_v63 = vadd.f32 %v1039_v61, %v831_v60 }
 0x16d   : > { %1938 = vmatprep.subr.bf16.mxu0 %v1937_v2  ;;  %1964 = vmatprep.subr.bf16.mxu1 %v2052_v9 }
 0x170   : > { %1940 = vmatpush1.bf16.msra.mxu0 %v1939_v8  ;;  %1966 = vmatpush3.bf16.msra.mxu1 %v1965_v12 }
 0x171   : > { %1942 = vmatprep.subr.bf16.mxu0 %v1941_v13  ;;  %1967 = vmatprep.subr.bf16.mxu1 %v2052_v9 }
 0x174   : > { %1944 = vmatpush1.bf16.msra.mxu0 %v1943_v19  ;;  %1969 = vmatpush3.bf16.msra.mxu1 %v1968_v22 }
 0x175   : > { %1946 = vmatprep.subr.bf16.mxu0 %v1945_v23  ;;  %1970 = vmatprep.subr.bf16.mxu1 %v2052_v9 }
 0x178   : > { %1948 = vmatpush1.bf16.msra.mxu0 %v1947_v27  ;;  %1972 = vmatpush3.bf16.msra.mxu1 %v1971_v28 }
 0x179   : > { %1973 = vmatprep.subr.bf16.mxu0 %v2052_v9 }
 0x17b   : > { %1112 = vmatmul.mubr.f32.vlgmr.msra.gmra.mrb[2].mxu0 %v2788_v29  ;;  %1712 = vmatmul.mubr.f32.vlgmr.msra.gmra.mrb[6].mxu1 %v2788_v29 }
 0x17c   : > { %1746 = vmatprep.mubr.msk.f32.mxu0 %vm2054_vm0, %v2053_v10  ;;  %1975 = vmatpush3.bf16.msra.mxu0 %v1974_v31  ;;  %v1213_v10 = vld [vmem:[%s2878_s5 + $0x18] sm:$0xff] }
 0x17d   : > { %1976 = vmatprep.subr.bf16.mxu0 %v2052_v9  ;;  %v1977_v33 = vpack.c.bf16 %v1213_v10, %v1212_v32 }
 0x180   : > { %1978 = vmatpush3.bf16.msra.mxu0 %v1977_v33 }
 0x181   : > { %1979 = vmatprep.subr.bf16.mxu0 %v2052_v9 }
 0x184   : > { %1981 = vmatpush3.bf16.msra.mxu0 %v1980_v36 }
 0x185   : > { %1982 = vmatprep.subr.bf16.mxu0 %v2052_v9 }
 0x188   : > { %1984 = vmatpush3.bf16.msra.mxu0 %v1983_v39 }
 0x189   : > { %1985 = vmatprep.subr.bf16.mxu0 %v2052_v9 }
 0x18c   : > { %1987 = vmatpush3.bf16.msra.mxu0 %v1986_v42 }
 0x18d   : > { %1988 = vmatprep.subr.bf16.mxu0 %v2052_v9 }
 0x190   : > { %1990 = vmatpush3.bf16.msra.mxu0 %v1989_v46 }
 0x191   : > { %1991 = vmatprep.subr.bf16.mxu0 %v2052_v9 }
 0x194   : > { %1993 = vmatpush3.bf16.msra.mxu0 %v1992_v50 }
 0x195   : > { %1994 = vmatprep.subr.bf16.mxu0 %v2052_v9  ;;  %v2001_v9 = vadd.f32 %v1035_v59, %v827_v58 }
 0x198   : > { %1996 = vmatpush3.bf16.msra.mxu0 %v1995_v53 }
 0x22e   : > { %v976_v54 = vpop.f32.mrb[4].mxu1 }
 0x22f   : > { %v1678_v55 = vpop.f32.mrb[5].mxu1  ;;  %v977_v16 = vadd.f32 %v976_v54, %v835_v47 }
 0x24e   : > { %v1113_v62 = vpop.f32.mrb[2].mxu0  ;;  %v1184_v1 = vpop.f32.mrb[6].mxu1 }
 0x24f   : > { %v2002_v2 = vadd.f32 %v2001_v9, %v1113_v62  ;;  %v1115_v3 = vpop.f32.mrb[3].mxu0  ;;  %v1713_v4 = vpop.f32.mrb[7].mxu1  ;;  %v1185_v14 = vadd.f32 %v1184_v1, %v1043_v44 }
 0x250   : > { %v2004_v6 = vadd.f32 %v2003_v63, %v1115_v3 }
 0x251   : > { %v1483_v5 = vmul.f32 -1.442695, %v2002_v2 }
 0x252   : > { %v1484_v7 = vmul.f32 -1.442695, %v2004_v6 }
 0x253   : > { %2030 = vpow2.f32 %v1483_v5 }
 0x254   : > { %2032 = vpow2.f32 %v1484_v7 }
 0x25d   : > { %v2031_v8 = vpop.eup %2030 }
 0x25e   : > { %v1192_v11 = vadd.f32 1.0, %v2031_v8  ;;  %v2033_v12 = vpop.eup %2032 }
 0x25f   : > { %v1199_v13 = vadd.f32 1.0, %v2033_v12 }
 0x260   : > { %2034 = vrcp.f32 %v1192_v11 }
 0x261   : > { %2036 = vrcp.f32 %v1199_v13 }
 0x26a   : > { %v2035_v15 = vpop.eup %2034 }
 0x26b   : > { %v1202_v17 = vmul.f32 %v2035_v15, %v1185_v14  ;;  %v2037_v19 = vpop.eup %2036 }
 0x26c   : > { %v1205_v20 = vsub.f32 1.0, %v2037_v19  ;;  %v1207_v24 = vmul.f32 %v2037_v19, %v2788_v29 }
 0x26d   : > { %v1203_v18 = vadd.f32 %v1202_v17, %v977_v16 }
 0x26f   : > { %2038 = vtanh.f32 %v1203_v18 }
 0x279   : > { %v2039_v22 = vpop.eup %2038 }
 0x27a   : > { %v1206_v23 = vmul.f32 %v2039_v22, %v1205_v20 }
 0x27c   : > { %v1208_v25 = vadd.f32 %v1207_v24, %v1206_v23 }
 0x27e   : > { %1485 = vst [vmem:[%s2882_s9 + $0x8] sm:$0xff] %v1208_v25  ;;  %1747 = vmatmul.mubr.f32.vlgmr.msra.gmra.mrb[4].mxu0 %v1208_v25 }
 0x351   : > { %v1299_v26 = vpop.f32.mrb[4].mxu0 }
 0x352   : > { %v1300_v27 = vadd.f32 %v1486_v0, %v1299_v26  ;;  %v1748_v28 = vpop.f32.mrb[5].mxu0 }
 0x354   : > { %1303 = vmax.xlane.f32.xlu0 %v1300_v27 }
 0x3e1   : > { %v1304_v30 = vpop.xlane.xlu0 %1303 }
 0x3e2   : > { %v1305_v21 = vsub.f32 %v1300_v27, %v1304_v30 }
 0x3e4   : > { %v1306_v31 = vmul.f32 1.442695, %v1305_v21 }
 0x3e6   : > { %2040 = vpow2.f32 %v1306_v31 }
 0x3f0   : > { %v2041_v29 = vpop.eup %2040 }
 0x3f1   : > { %1308 = vadd.xlane.f32.xlu0 %v2041_v29 }
 0x47e   : > { %v1309_v32 = vpop.xlane.xlu0 %1308 }
 0x47f   : > { %2042 = vlog2.f32 %v1309_v32 }
 0x489   : > { %v2043_v10 = vpop.eup %2042 }
 0x48a   : > { %v1311_v33 = vmul.f32 0.6931472, %v2043_v10 }
 0x48c   : > { %v1312_v34 = vadd.f32 %v1311_v33, %v1304_v30 }
 0x48e   : > { %v1313_v35 = vsub.f32 %v1300_v27, %v1312_v34 }
 0x490   : > { %1314 = vst [vmem:[%s2121_s18] sm:$0xff] %v1313_v35 }
 0x491 PF: > { %s20_s30 = sadd.s32 1, %s2050_s30  }
 0x492   : > { %p17_p5 = scmp.ge.s32.totalorder %s20_s30, 10  }
 0x494   :  { %19 = sbr.rel (!%p17_p5) target bundleno = 1 (0x1), region = 99 }

</bundles_post_ra>
